<compile_context>
chip_gen: v5e
topology: v5e:2x2
jax: 0.10.0
libtpu: 0.0.40
codegen_flags: <defaults>
</compile_context>

<pallas_src>
import functools

import jax
import jax.numpy as jnp
from jax.experimental import pallas as pl
from jax.experimental.pallas import tpu as pltpu


# ---------------------------------------------------------------------------
# Kernel: one (TM, TN) output tile of  s * cosine  with the margin applied.
# Grid = (C // TN, B // TM): C tiles outer ("parallel"), B tiles inner
# ("arbitrary") so the weight tile stays resident across the inner loop.
# ---------------------------------------------------------------------------
def _margin_softmax_kernel(emb_ref, w_ref, lab_ref, out_ref, invw_ref,
                           *, s, m, tn, eps):
    j = pl.program_id(0)          # C-tile index (outer)
    i = pl.program_id(1)          # B-tile index (inner)

    w = w_ref[...]                                         # (D, TN) f32/bf16

    # Per-column inverse L2 norms of this weight tile.  The tile only depends
    # on j, so it is resident across the inner B loop: compute once (i == 0)
    # and cache in VMEM scratch.
    @pl.when(i == 0)
    def _():
        wf = w.astype(jnp.float32)
        col_sq = jnp.sum(wf * wf, axis=0, keepdims=True)   # (1, TN)
        invw_ref[...] = jax.lax.rsqrt(
            jnp.maximum(col_sq, jnp.float32(eps * eps)))

    # Row scale  s / max(||emb_row||, eps)  folded into the MXU LHS so the
    # epilogue needs only one (TM, TN) multiply.
    emb = emb_ref[...]                                     # (TM, D) f32
    emb_sq = jnp.sum(emb * emb, axis=1, keepdims=True)     # (TM, 1)
    row_scale = jnp.float32(s) * jax.lax.rsqrt(
        jnp.maximum(emb_sq, jnp.float32(eps * eps)))
    lhs = (emb * row_scale).astype(w.dtype)                # (TM, D)

    dot = jnp.dot(lhs, w, preferred_element_type=jnp.float32)   # (TM, TN) f32
    cos_s = dot * invw_ref[...]                            # s * cosine

    # CosFace margin at the label column of this C tile (fused select).
    # label == -1 never equals a column id -> those rows get no margin.
    lab = lab_ref[...]                                     # (TM, 1) int32
    col_ids = j * tn + jax.lax.broadcasted_iota(jnp.int32, cos_s.shape, 1)
    out_ref[...] = jnp.where(col_ids == lab,
                             cos_s - jnp.float32(s * m), cos_s)


def _pick_tile(dim, requested, candidates):
    if requested is not None:
        assert dim % requested == 0, f"tile {requested} must divide {dim}"
        return requested
    for c in candidates:
        if dim % c == 0:
            return c
    return dim  # small / odd extent: single full-width tile on this axis


def margin_softmax_classifier(embedding, weight, label, *, s=64.0, m=0.4,
                              tm=None, tn=None, use_bf16=False,
                              vmem_limit_bytes=None):
    """embedding: (B, D) f32, weight: (D, C) f32, label: (B,) int32 (-1=ignore).

    Tile-size guidance (D = 512, f32 weight stream, weight resident over B):
      v7x (64 MiB VMEM):  tm=256, tn=2048  (~10 MiB live, double-buffered)
      v6e (128 MiB VMEM): tm=256, tn=2048-4096, raise vmem_limit_bytes
      v5e:                tm=128, tn multiple of 128; prefer use_bf16=True
    """
    B, D = embedding.shape
    D2, C = weight.shape
    assert D == D2, "embedding / weight feature dims must match"
    eps = 1e-12

    tm = _pick_tile(B, tm, (256, 128, 64, 32, 16, 8))
    tn = _pick_tile(C, tn, (2048, 1024, 512, 256, 128))

    label2d = label.reshape(B, 1).astype(jnp.int32)

    # Optionally stream the MXU operands as bf16 (halves weight HBM traffic,
    # doubles MXU rate); accumulation and all epilogue math remain f32.
    w_in = weight.astype(jnp.bfloat16) if use_bf16 else weight

    kernel = functools.partial(_margin_softmax_kernel,
                               s=float(s), m=float(m), tn=tn, eps=eps)

    return pl.pallas_call(
        kernel,
        out_shape=jax.ShapeDtypeStruct((B, C), jnp.float32),
        grid_spec=pltpu.PrefetchScalarGridSpec(
            num_scalar_prefetch=0,
            grid=(C // tn, B // tm),            # C tiles outer, B tiles inner
            in_specs=[
                pl.BlockSpec((tm, D), lambda j, i: (i, 0)),   # embedding tile
                pl.BlockSpec((D, tn), lambda j, i: (0, j)),   # weight tile (resident over i)
                pl.BlockSpec((tm, 1), lambda j, i: (i, 0)),   # labels
            ],
            out_specs=pl.BlockSpec((tm, tn), lambda j, i: (i, j)),
            scratch_shapes=[pltpu.VMEM((1, tn), jnp.float32)],  # 1/||W_col|| cache
        ),
        compiler_params=pltpu.CompilerParams(
            dimension_semantics=("parallel", "arbitrary"),
            vmem_limit_bytes=vmem_limit_bytes,
        ),
    )(embedding, w_in, label2d)


# ---------------------------------------------------------------------------
# Pure-JAX reference (mirrors the PyTorch module exactly).
# ---------------------------------------------------------------------------
def _reference(embedding, weight, label, s=64.0, m=0.4):
    eps = 1e-12
    emb_n = embedding / jnp.maximum(
        jnp.linalg.norm(embedding, axis=1, keepdims=True), eps)
    w_n = weight / jnp.maximum(
        jnp.linalg.norm(weight, axis=0, keepdims=True), eps)
    cosine = emb_n @ w_n
    onehot = jax.nn.one_hot(label, weight.shape[1], dtype=jnp.float32)
    valid = (label != -1)[:, None].astype(jnp.float32)
    return (cosine - m * onehot * valid) * s


if __name__ == "__main__":
    key = jax.random.PRNGKey(0)
    k_emb, k_w, k_lab = jax.random.split(key, 3)

    B = 16              # batch
    in_features = 32    # embedding dim D
    out_features = 256  # number of classes C
    s_scale, margin = 64.0, 0.4

    embedding = jax.random.normal(k_emb, (B, in_features), dtype=jnp.float32)

    # Deterministic xavier_uniform-style init for the classifier kernel.
    bound = (6.0 / (in_features + out_features)) ** 0.5
    weight = jax.random.uniform(
        k_w, (in_features, out_features), minval=-bound, maxval=bound,
        dtype=jnp.float32)

    # Labels in [0, out_features), with a couple of -1 "ignore" entries.
    label = jax.random.randint(k_lab, (B,), 0, out_features, dtype=jnp.int32)
    label = label.at[1].set(-1).at[5].set(-1)

    ref = _reference(embedding, weight, label, s=s_scale, m=margin)

    # 1) f32 path, forced 2x2 tile grid (exercises column offsets, weight
    #    residency across the inner B loop and the col-norm scratch caching).
    out = margin_softmax_classifier(embedding, weight, label,
                                    s=s_scale, m=margin, tm=8, tn=128)
    out = jax.block_until_ready(out)
    assert out.shape == (B, out_features)
    assert jnp.allclose(out, ref, atol=1e-3, rtol=1e-3), "f32 tiled mismatch"

    # 2) f32 path, default (single-tile) grid.
    out_d = margin_softmax_classifier(embedding, weight, label,
                                      s=s_scale, m=margin)
    out_d = jax.block_until_ready(out_d)
    assert jnp.allclose(out_d, ref, atol=1e-3, rtol=1e-3), "f32 default mismatch"

    # 3) bf16 MXU-operand path (f32 accumulation / normalization / margin).
    out_bf16 = margin_softmax_classifier(embedding, weight, label,
                                         s=s_scale, m=margin, use_bf16=True)
    out_bf16 = jax.block_until_ready(out_bf16)
    assert jnp.allclose(out_bf16, ref, atol=0.5, rtol=0.05), "bf16 mismatch"

    print("KERNEL_OK")
</pallas_src>

<mosaic_0001>
module attributes {stable_mosaic.version = 11 : i64} {
  func.func @_margin_softmax_kernel(%arg0: i32, %arg1: i32, %arg2: memref<8x32xf32, #tpu.memory_space<vmem>>, %arg3: memref<32x128xf32, #tpu.memory_space<vmem>>, %arg4: memref<8x1xi32, #tpu.memory_space<vmem>>, %arg5: memref<8x128xf32, #tpu.memory_space<vmem>>, %arg6: memref<1x128xf32, #tpu.memory_space<vmem>>) attributes {dimension_semantics = [#tpu.dimension_semantics<parallel>, #tpu.dimension_semantics<arbitrary>], iteration_bounds = array<i64: 2, 2>, scalar_prefetch = 0 : i64, scratch_operands = 1 : i64, tpu.core_type = #tpu.core_type<tc>, window_params = [{transform_indices = @transform_0, window_bounds = array<i64: 8, 32>}, {transform_indices = @transform_1, window_bounds = array<i64: 32, 128>}, {transform_indices = @transform_2, window_bounds = array<i64: 8, 1>}, {transform_indices = @transform_3, window_bounds = array<i64: 8, 128>}]} {
    %c0 = arith.constant 0 : index
    %c0_0 = arith.constant 0 : index
    %0 = vector.load %arg3[%c0, %c0_0] : memref<32x128xf32, #tpu.memory_space<vmem>>, vector<32x128xf32>
    %c0_i32 = arith.constant 0 : i32
    %1 = arith.cmpi eq, %arg1, %c0_i32 : i32
    %2 = arith.extui %1 : i1 to i32
    %c0_i32_1 = arith.constant 0 : i32
    %3 = arith.cmpi ne, %2, %c0_i32_1 : i32
    scf.if %3 {
      %30 = arith.mulf %0, %0 : vector<32x128xf32>
      %cst_14 = arith.constant dense<0.000000e+00> : vector<128xf32>
      %31 = vector.multi_reduction <add>, %30, %cst_14 [0] : vector<32x128xf32> to vector<128xf32>
      %32 = vector.shape_cast %31 : vector<128xf32> to vector<1x128xf32>
      %cst_15 = arith.constant 1.000000e-24 : f32
      %33 = vector.broadcast %cst_15 : f32 to vector<1x128xf32>
      %34 = arith.maximumf %32, %33 : vector<1x128xf32>
      %35 = math.rsqrt %34 : vector<1x128xf32>
      %c0_16 = arith.constant 0 : index
      %c0_17 = arith.constant 0 : index
      %36 = vector.load %arg6[%c0_16, %c0_17] : memref<1x128xf32, #tpu.memory_space<vmem>>, vector<1x128xf32>
      tpu.vector_store %arg6[%c0_16, %c0_17], %35 {strides = array<i32>} : memref<1x128xf32, #tpu.memory_space<vmem>>, vector<1x128xf32>,
    } else {
    }
    %c0_2 = arith.constant 0 : index
    %c0_3 = arith.constant 0 : index
    %4 = vector.load %arg2[%c0_2, %c0_3] : memref<8x32xf32, #tpu.memory_space<vmem>>, vector<8x32xf32>
    %5 = arith.mulf %4, %4 : vector<8x32xf32>
    %cst = arith.constant dense<0.000000e+00> : vector<8xf32>
    %6 = vector.multi_reduction <add>, %5, %cst [1] : vector<8x32xf32> to vector<8xf32>
    %7 = vector.shape_cast %6 : vector<8xf32> to vector<8x1xf32>
    %cst_4 = arith.constant 1.000000e-24 : f32
    %8 = vector.broadcast %cst_4 : f32 to vector<8x1xf32>
    %9 = arith.maximumf %7, %8 : vector<8x1xf32>
    %10 = math.rsqrt %9 : vector<8x1xf32>
    %cst_5 = arith.constant 6.400000e+01 : f32
    %11 = vector.broadcast %cst_5 : f32 to vector<8x1xf32>
    %12 = arith.mulf %11, %10 : vector<8x1xf32>
    %13 = vector.broadcast %12 : vector<8x1xf32> to vector<8x32xf32>
    %14 = arith.mulf %4, %13 : vector<8x32xf32>
    %cst_6 = arith.constant dense<0.000000e+00> : vector<8x128xf32>
    %15 = tpu.matmul %14, %0, %cst_6 {dimension_numbers = #tpu.dot_dimension_numbers<[1], [0], [0], [1], [0, 0, 1, 1], [], []>} : vector<8x32xf32>, vector<32x128xf32>, vector<8x128xf32> -> vector<8x128xf32>
    %c0_7 = arith.constant 0 : index
    %c0_8 = arith.constant 0 : index
    %16 = vector.load %arg6[%c0_7, %c0_8] : memref<1x128xf32, #tpu.memory_space<vmem>>, vector<1x128xf32>
    %17 = vector.broadcast %16 : vector<1x128xf32> to vector<8x128xf32>
    %18 = arith.mulf %15, %17 : vector<8x128xf32>
    %c0_9 = arith.constant 0 : index
    %c0_10 = arith.constant 0 : index
    %19 = vector.load %arg4[%c0_9, %c0_10] : memref<8x1xi32, #tpu.memory_space<vmem>>, vector<8x1xi32>
    %c128_i32 = arith.constant 128 : i32
    %20 = arith.muli %arg0, %c128_i32 : i32
    %21 = tpu.iota {dimensions = array<i32: 1>} : vector<8x128xi32>
    %22 = vector.broadcast %20 : i32 to vector<8x128xi32>
    %23 = arith.addi %22, %21 : vector<8x128xi32>
    %24 = vector.broadcast %19 : vector<8x1xi32> to vector<8x128xi32>
    %25 = arith.cmpi eq, %23, %24 : vector<8x128xi32>
    %cst_11 = arith.constant 2.560000e+01 : f32
    %26 = vector.broadcast %cst_11 : f32 to vector<8x128xf32>
    %27 = arith.subf %18, %26 : vector<8x128xf32>
    %28 = arith.select %25, %27, %18 : vector<8x128xi1>, vector<8x128xf32>
    %c0_12 = arith.constant 0 : index
    %c0_13 = arith.constant 0 : index
    %29 = vector.load %arg5[%c0_12, %c0_13] : memref<8x128xf32, #tpu.memory_space<vmem>>, vector<8x128xf32>
    tpu.vector_store %arg5[%c0_12, %c0_13], %28 {strides = array<i32>} : memref<8x128xf32, #tpu.memory_space<vmem>>, vector<8x128xf32>,
    return
  }
  func.func @transform_0(%arg0: i32, %arg1: i32) -> (i32, i32) {
    %c0_i32 = arith.constant 0 : i32
    %c0_i32_0 = arith.constant 0 : i32
    return %arg1, %c0_i32 : i32, i32
  }
  func.func @transform_1(%arg0: i32, %arg1: i32) -> (i32, i32) {
    %c0_i32 = arith.constant 0 : i32
    %c0_i32_0 = arith.constant 0 : i32
    return %c0_i32, %arg0 : i32, i32
  }
  func.func @transform_2(%arg0: i32, %arg1: i32) -> (i32, i32) {
    %c0_i32 = arith.constant 0 : i32
    %c0_i32_0 = arith.constant 0 : i32
    return %arg1, %c0_i32 : i32, i32
  }
  func.func @transform_3(%arg0: i32, %arg1: i32) -> (i32, i32) {
    %c0_i32 = arith.constant 0 : i32
    return %arg1, %arg0 : i32, i32
  }
}

</mosaic_0001>

<bundles_post_ra>
// kernel: tpu_custom_call.1
= control target key start
LH: loop header
LB: loop body
LE: loop exit
PB: predicated region body
PF: predicated region fallthrough
CT: control target
= control target key end

     0   :  { %8 = vsyncpa [#allocation4], 0  ;;  %s961_s0 = inlined_call_operand.vmem [shape: f32[16,32], index: 0, kind: input, shape index: {}]   ;;  %s962_s1 = inlined_call_operand.hbm [shape: f32[32,256], index: 1, kind: input, shape index: {}]   ;;  %s963_s2 = inlined_call_operand.vmem [shape: s32[16,1], index: 2, kind: input, shape index: {}]   ;;  %s964_s3 = inlined_call_operand.hbm [shape: f32[16,256], index: 3, kind: output, shape index: {}]  }
   0x1   :  { %10 = vsyncpa [#allocation4 + $0x1], 0 }
   0x2   :  { %11 = vsyncpa [#allocation5], 0 }
   0x3   :  { %13 = vsyncpa [#allocation5 + $0x1], 0  ;;  %s766_s12 = smov 0   ;;  %s768_s13 = smov 0  }
   0x4   :  { %s770_s14 = smov 0   ;;  %s772_s15 = smov 0  }
   0x5   :  { %s774_s16 = smov 0   ;;  %s776_s17 = smov 0  }
   0x6   :  { %s778_s18 = smov 0   ;;  %s780_s19 = smov 0  }
   0x7   :  { %s782_s20 = smov 0   ;;  %s784_s21 = smov 0  }
   0x8   :  { %s786_s22 = smov 0  }
   0x9 LB: > { %968 = sst [smem:[#allocation9_spill]] %s732_s20  ;;  %s456_s23 = sadd.s32 4294967295, %s740_s22   ;;  %s740_s22 = sphi %s786_s22, %s19_s22   ;;  %s736_s21 = sphi %s784_s21, %s987_s21   ;;  %s732_s20 = sphi %s782_s20, %s978_s20   ;;  %s728_s19 = sphi %s780_s19, %s986_s19   ;;  %s724_s18 = sphi %s778_s18, %s977_s18   ;;  %s720_s17 = sphi %s776_s17, %s985_s17   ;;  %s716_s16 = sphi %s774_s16, %s984_s16   ;;  %s712_s15 = sphi %s772_s15, %s983_s15   ;;  %s708_s14 = sphi %s770_s14, %s982_s14   ;;  %s704_s13 = sphi %s768_s13, %s981_s13   ;;  %s700_s12 = sphi %s766_s12, %s980_s12  }
   0xa   : > { %s457_s24 = sadd.s32 4294967294, %s740_s22   ;;  %s28_s25 = sadd.s32 1, %s732_s20 }
   0xb   : > { %s31_s26 = sadd.s32 1, %s736_s21  ;;  %p29_p0 = scmp.ge.s32.totalorder %s28_s25, 2 }
   0xc   : > { %s64_s27 = sadd.s32 1, %s720_s17  ;;  %p71_p1 = scmp.ne.s32.totalorder %s720_s17, %s716_s16 }
   0xd   : > { %p72_p2 = scmp.eq.s32.totalorder %s740_s22, 0  ;;  %s989_s25 = smov (%p29_p0, %s28_s25), 0 }
   0xe   : > { %969 = sst [smem:[#allocation10_spill]] %s989_s25  ;;  %s991_s26 = smov (!%p29_p0, %s31_s26), %s736_s21 }
   0xf   : > { %p830_p3 = por %p72_p2, %p71_p1  ;;  %p77_p4 = scmp.ne.s32.totalorder %s716_s16, %s712_s15 }
  0x10   : > { %p33_p5 = scmp.ge.s32.totalorder %s991_s26, 2  ;;  %p78_p6 = scmp.eq.s32.totalorder %s456_s23, 0 }
  0x11   : > { %s113_s29 = ssub.s32 %s732_s20, %s989_s25  ;;  %s118_s30 = sadd.s32 1, %s708_s14 }
  0x12   : > { %s993_s26 = smov (%p33_p5, %s991_s26), 0  ;;  %p840_p7 = por %p78_p6, %p77_p4 }
  0x13   : > { %971 = sst [smem:[#allocation11_spill]] %s993_s26  ;;  %p128_p8 = scmp.ne.s32.totalorder %s708_s14, %s704_s13 }
  0x14   : > { %s61_s5 = ssub.s32 %s736_s21, %s993_s26  ;;  %p129_p9 = scmp.eq.s32.totalorder %s456_s23, 3 }
  0x15   : > { %p62_p10 = scmp.eq.s32.totalorder %s61_s5, 0  ;;  %s115_s6 = sor.u32 %s113_s29, %s61_s5 }
  0x16   : > { %p116_p11 = scmp.eq.s32.totalorder %s115_s6, 0  ;;  %p848_p12 = por %p129_p9, %p128_p8 }
  0x17   : > { %s853_s8 = scalar_select %p62_p10, %s720_s17, %s64_s27  }
  0x18   : > { %s856_s9 = scalar_select %p116_p11, %s708_s14, %s118_s30  }
  0x19   : > { %974 = sst [smem:[#allocation12_spill]] %s853_s8  ;;  %p134_p13 = scmp.ne.s32.totalorder %s704_s13, %s700_s12 }
  0x1a   : > { %p135_p0 = scmp.eq.s32.totalorder %s457_s24, 3  ;;  %p488_p1 = scmp.lt.s32.totalorder %s740_s22, 4 }
  0x1b   : > { %s162_s11 = sand.u32 1, %s720_s17   ;;  %s461_s23 = sshll.u32 %s736_s21, 3 }
  0x1c   : > { %p861_p2 = por %p135_p0, %p134_p13  ;;  %s460_s15 = sshll.u32 %s162_s11, 5 }
  0x1d   : > { %s170_s6 = scalar_lea.hbm %s962_s1, %s461_s23  ;;  %s166_s27 = scalar_lea.vmem [#allocation3], %s460_s15 }
  0x1e   : > { %s173_s26 = sshll.u32 %s166_s27, 4  ;;  %s171_s30 = sshll.u32 %s170_s6, 4  ;;  %s174_s26 = int_to_ptr.vmem [resolvable:$true] %s173_s26  ;;  %s172_s30 = int_to_ptr.hbm [resolvable:$true] %s171_s30 }
  0x1f   : > { %p481_p4 = pnand %p488_p1, %p830_p3  ;;  %s163_s24 = scalar_lea.sflag [#allocation4], %s162_s11 }
  0x20   : > { %s742_s25 = smov 256   ;;  %s743_s20 = smov 128  }
  0x21   : > { %s744_s8 = smov 8   ;;  %p462_p5 = scmp.ge.s32.totalorder %s740_s22, 1 }
  0x22   : > { %483 = dma.hbm_to_vmem [thread:$0]  (!%p481_p4), %s172_s30, 512, %s174_s26, %s163_s24, %s742_s25, %s743_s20, %s744_s8  }
  0x23   : > { %p188_p6 = scmp.lt.s32.totalorder %s740_s22, 5 }
  0x25   : > { %p189_p8 = pnand %p462_p5, %p188_p6 }
  0x26   : > { %s194_s29 = sand.u32 (!%p189_p8), 1, %s716_s16  }
  0x27   : > { %192 = sbr.rel (%p189_p8) target bundleno = 372 (0x174), region = 32  ;;  %s463_s23 = sshll.u32 (!%p189_p8), %s194_s29, 5 }
  0x28   : > { %s195_s15 = scalar_lea.sflag (!%p189_p8), [#allocation4], %s194_s29  ;;  %s198_s5 = scalar_lea.vmem (!%p189_p8), [#allocation3], %s463_s23 }
  0x2c   : > { %691 = dma.done.wait (%p840_p7), %s195_s15, 512  }
  0x2d   : > { %693 = vsyncadd (%p840_p7), %s195_s15, 4294966784  ;;  %s227_s20 = sand.u32 1, %s704_s13   ;;  %p230_p3 = scmp.lt.s32.totalorder %s724_s18, 1  ;;  %v238_v0 = vld [vmem:[%s198_s5] sm:$0xff]  ;;  %v239_v1 = vld [vmem:[%s198_s5 + $0x8] sm:$0xff] }
  0x2e   : > { %s883_s25 = sshll.u32 %s227_s20, 3  ;;  %v240_v2 = vld [vmem:[%s198_s5 + $0x10] sm:$0xff]  ;;  %v241_v3 = vld [vmem:[%s198_s5 + $0x18] sm:$0xff]  ;;  %p467_p7 = scmp.ne.s32.totalorder %s724_s18, 0 }
  0x2f   : > { %s231_s26 = scalar_select %p230_p3, %s724_s18, 1 }
  0x30   : > { %s229_s24 = scalar_lea.vmem [#allocation6], %s883_s25  ;;  %245 = sbr.rel (%p467_p7) target bundleno = 94 (0x5e), region = 40 }
  0x31   : > { %s465_s28 = sshll.u32 %s231_s26, 3 }
  0x32   : > { %s889_s6 = scalar_lea.vmem %s961_s0, %s465_s28  ;;  %s894_s30 = scalar_lea.vmem %s963_s2, %s465_s28 }
  0x35   : > { %v246_v4 = vmul.f32 %v238_v0, %v238_v0  ;;  %v247_v5 = vmul.f32 %v239_v1, %v239_v1  ;;  %v248_v6 = vmul.f32 %v240_v2, %v240_v2  ;;  %v249_v7 = vmul.f32 %v241_v3, %v241_v3 }
  0x37   : > { %v250_v8 = vadd.f32 %v247_v5, %v246_v4 }
  0x39   : > { %v251_v9 = vadd.f32 %v250_v8, %v248_v6 }
  0x3b   : > { %v252_v10 = vadd.f32 %v251_v9, %v249_v7 }
  0x3d   : > { %v253_v11 = vrot.slane %v252_v10, 4 }
  0x3f   : > { %v254_v12 = vadd.f32 %v253_v11, %v252_v10 }
  0x41   : > { %v255_v13 = vrot.slane %v254_v12, 2 }
  0x43   : > { %v256_v14 = vadd.f32 %v255_v13, %v254_v12 }
  0x45   : > { %v257_v15 = vrot.slane %v256_v14, 1 }
  0x47   : > { %v258_v16 = vadd.f32 %v257_v15, %v256_v14 }
  0x49   : > { %v259_v17 = vmax.f32 %v258_v16, 1e-24 }
  0x4b   : > { %582 = vrsqrt.f32 %v259_v17  ;;  %vm266_vm0 = vweird.f32 %v259_v17 }
  0x51   : > { %v583_v18 = vpop.eup %582 }
  0x52   : > { %v261_v19 = vmul.f32 %v583_v18, %v259_v17  ;;  %vm267_vm1 = vweird.f32 %v583_v18 }
  0x53   : > { %vm268_vm2 = vmor %vm266_vm0, %vm267_vm1 }
  0x54   : > { %v262_v20 = vmul.f32 %v583_v18, %v261_v19 }
  0x56   : > { %v263_v21 = vmul.f32 0.5, %v262_v20 }
  0x58   : > { %v264_v22 = vsub.f32 1.5, %v263_v21 }
  0x5a   : > { %v265_v23 = vmul.f32 %v583_v18, %v264_v22 }
  0x5c   : > { %v269_v24 = vsel %vm268_vm2, %v583_v18, %v265_v23 }
  0x5d   : > { %270 = vst [vmem:[#allocation2] sm:$0x1] %v269_v24 }
  0x5e PF: > { %v271_v25 = vld [vmem:[%s889_s6] sm:$0xff]  ;;  %vm273_vm3 = vcmask 261120   ;;  %305 = vmatpush.msra.mxu0 %v241_v3  ;;  %v745_v29 = vmov 0   ;;  %s472_s29 = sshll.u32 %s724_s18, 1  ;;  %v320_v41 = vlaneseq  ;;  %s469_s23 = sshll.u32 %s728_s19, 7 }
  0x5f   : > { %v272_v26 = vmul.f32 %v271_v25, %v271_v25  ;;  %v318_v28 = vld [vmem:[%s894_s30] sm:$0xff]  ;;  %584 = vset.pattern.permute.xlu0 %v745_v29  ;;  %s342_s15 = sadd.s32 %s728_s19, %s472_s29  ;;  %v322_v43 = vstv %s469_s23  ;;  %s346_s18 = sshll.u32 %s229_s24, 4  ;;  %s347_s18 = int_to_ptr.vmem [resolvable:$true] %s346_s18 }
  0x60   : > { %306 = vmatpush.msra.mxu0 %v240_v2  ;;  %v321_v42 = vand.u32 127, %v320_v41  ;;  %s473_s5 = sshll.u32 %s342_s15, 3  ;;  %s332_s19 = scalar_lea.sflag [#allocation5], %s227_s20 }
  0x61   : > { %v274_v27 = vsel %vm273_vm3, %v272_v26, 0.0  ;;  %s344_s8 = scalar_lea.hbm %s964_s3, %s473_s5  ;;  %s638_s29 = scalar_lea.hbm %s964_s3, 32 }
  0x62   : > { %275 = vadd.xlane.f32.xlu0 %v274_v27  ;;  %307 = vmatpush.msra.mxu0 %v239_v1  ;;  %v323_v45 = vadd.s32 %v322_v43, %v321_v42  ;;  %s348_s11 = sshll.u32 %s344_s8, 4  ;;  %s349_s11 = int_to_ptr.hbm [resolvable:$true] %s348_s11 }
  0x63   : > { %s632_s6 = sshra.s32 %s349_s11, 4  ;;  %s633_s6 = int_to_ptr.hbm [resolvable:$true] %s632_s6 }
  0x64   : > { %308 = vmatpush.msra.mxu0 %v238_v0  ;;  %v585_v44 = vld [vmem:[#allocation2] ss:$0 sm:$0xff]  ;;  %s634_s27 = scalar_lea.hbm %s633_s6, 8  ;;  %p639_p13 = scmp.lt.s32.totalorder %s633_s6, %s964_s3 }
  0x65   : > { %p635_p9 = scmp.ne.s32.totalorder %s633_s6, %s634_s27  ;;  %p640_p0 = scmp.lt.s32.totalorder %s638_s29, %s634_s27 }
  0x67   : > { %p636_p10 = pnand %p635_p9, %p848_p12  ;;  %p641_p1 = por %p640_p0, %p639_p13 }
  0x69   : > { %p637_p11 = pneg %p636_p10 }
  0x6b   : > { %p642_p4 = pnand %p641_p1, %p637_p11 }
  0x76   : > { %325 = vperm.xlu0 %584, %v318_v28  }
  0xd5   : > { %v276_v30 = vpop.xlane.xlu0 %275 }
  0xd6   : > { %v277_v31 = vmax.f32 %v276_v30, 1e-24 }
  0xd8   : > { %586 = vrsqrt.f32 %v277_v31  ;;  %vm284_vm5 = vweird.f32 %v277_v31 }
  0xde   : > { %v587_v32 = vpop.eup %586 }
  0xdf   : > { %v279_v33 = vmul.f32 %v587_v32, %v277_v31  ;;  %vm285_vm4 = vweird.f32 %v587_v32 }
  0xe0   : > { %vm286_vm6 = vmor %vm284_vm5, %vm285_vm4 }
  0xe1   : > { %v280_v34 = vmul.f32 %v587_v32, %v279_v33 }
  0xe3   : > { %v281_v35 = vmul.f32 0.5, %v280_v34 }
  0xe5   : > { %v282_v36 = vsub.f32 1.5, %v281_v35 }
  0xe7   : > { %v283_v37 = vmul.f32 %v587_v32, %v282_v36 }
  0xe8   : > { %v326_v46 = vpop.permute.xlu0 %325 }
  0xe9   : > { %v287_v38 = vsel %vm286_vm6, %v587_v32, %v283_v37  ;;  %vm327_vm7 = vcmp.eq.s32.totalorder %v323_v45, %v326_v46 }
  0xea   : > { %v288_v39 = vmul.f32 64.0, %v287_v38 }
  0xec   : > { %v289_v40 = vmul.f32 %v288_v39, %v271_v25 }
  0xee   : > { %468 = vmatmul.msk.f32.vlgmr.msra.gmra.mxu0 %vm273_vm3, %v289_v40 }
 0x16b   : > { %v310_v47 = vpop.f32.mrf.mxu0 }
 0x16c   : > { %v317_v48 = vmul.f32 %v585_v44, %v310_v47 }
 0x16e   : > { %v470_v49 = vadd.f32 -25.6, %v317_v48 }
 0x170   : > { %v329_v50 = vsel %vm327_vm7, %v470_v49, %v317_v48 }
 0x171   : > { %330 = vst [vmem:[%s229_s24] sm:$0xff] %v329_v50 }
 0x172   : > { %645 = shalt.err (!%p642_p4)
}
 0x173   : > { %478 = dma.vmem_to_hbm [thread:$0]  (%p848_p12), %s347_s18, 128, %s349_s11, %s332_s19  }
 0x174 PF: > { %p489_p5 = scmp.ge.s32.totalorder %s740_s22, 2  ;;  %s360_s20 = sand.u32 1, %s700_s12  }
 0x175   : > { %s361_s25 = scalar_lea.sflag [#allocation5], %s360_s20 }
 0x176   : > { %p485_p6 = pnand %p489_p5, %p861_p2 }
 0x178   : > { %p486_p8 = pneg %p485_p6 }
 0x17a   : > { %695 = dma.done.wait (%p486_p8), %s361_s25, 128  }
 0x17b   : > { %697 = vsyncadd (%p486_p8), %s361_s25, 4294967168  ;;  %s19_s22 = sadd.s32 1, %s740_s22   ;;  %s976_s7 = sld [smem:[#allocation12_spill]] }
 0x17c   : > { %p16_p3 = scmp.ge.s32.totalorder %s19_s22, 6   ;;  %s977_s18 = sld [smem:[#allocation9_spill]] }
 0x17d   : > { %s978_s20 = sld [smem:[#allocation10_spill]]  ;;  %s980_s12 = smov %s704_s13 }
 0x17e   : > { %s979_s24 = sld [smem:[#allocation11_spill]]  ;;  %s981_s13 = smov %s708_s14 }
 0x17f   : > { %s982_s14 = smov %s856_s9  ;;  %s983_s15 = smov %s716_s16 }
 0x180   : > { %s984_s16 = smov %s720_s17  ;;  %s986_s19 = smov %s736_s21 }
 0x181   : > { %s985_s17 = smov %s976_s7  ;;  %18 = sbr.rel (!%p16_p3) target bundleno = 9 (0x9), region = 87 }
 0x184   : > { %s987_s21 = smov %s979_s24 }
 0x186   :  { %367 = vsyncpa [#allocation4], 1 }
 0x187   :  { %369 = vsyncpa [#allocation4 + $0x1], 1 }
 0x188   :  { %370 = vsyncpa [#allocation5], 1 }
 0x189   :  { %372 = vsyncpa [#allocation5 + $0x1], 1 }

</bundles_post_ra>
